<compile_context>
chip_gen: v5e
topology: v5e:2x2
jax: 0.10.0
libtpu: 0.0.40
codegen_flags: <defaults>
</compile_context>

<pallas_src>
import jax
import jax.numpy as jnp
from jax.experimental import pallas as pl
from jax.experimental.pallas import tpu as pltpu


# --------------------------------------------------------------------------
# Generation-aware tiling configuration
# --------------------------------------------------------------------------
_ROW_GRANULE = 16          # bf16 sublane tile
_MAX_TILE_ROWS = 4096


def _detect_tpu():
    """(physical_vmem_bytes, tensorcores_per_chip, bf16_vpu) with safe fallbacks."""
    kind = ""
    try:
        kind = jax.devices()[0].device_kind.lower()
    except Exception:
        pass
    vmem = None
    try:
        vmem = int(pltpu.get_tpu_info().vmem_capacity_bytes)
    except Exception:
        vmem = None
    if "v7" in kind:
        num_tc, bf16_vpu, dflt = 2, True, 64 << 20
    elif "v6" in kind:
        num_tc, bf16_vpu, dflt = 1, True, 128 << 20
    elif "v5e" in kind or "lite" in kind:
        num_tc, bf16_vpu, dflt = 1, False, 128 << 20
    elif "v5" in kind or "v4" in kind:            # v5p / v4 megacore
        num_tc, bf16_vpu, dflt = 2, False, 128 << 20
    else:
        num_tc, bf16_vpu, dflt = 2, False, 64 << 20   # conservative defaults
    return (vmem if vmem else dflt), num_tc, bf16_vpu


_VMEM_CAP_BYTES, _NUM_TC, _BF16_EPILOGUE = _detect_tpu()
if _VMEM_CAP_BYTES >= (96 << 20):      # v5e / v5p / v6e: 128 MiB VMEM, go big
    _TILE_VMEM_BUDGET = 28 << 20
    _VMEM_LIMIT_BYTES = 100 << 20
else:                                  # v7x: 64 MiB per TensorCore
    _TILE_VMEM_BUDGET = 14 << 20
    _VMEM_LIMIT_BYTES = 48 << 20


def _round_up(x, m):
    return ((x + m - 1) // m) * m


def _pick_tile_rows(P, bytes_per_row):
    """Largest row tile fitting the per-tile VMEM budget.  Prefers an exact
    divisor of P (drops pad/slice HBM copies); keeps >=2 grid steps only when
    the chip has >=2 TensorCores so both get work."""
    cap = _TILE_VMEM_BUDGET // max(int(bytes_per_row), 1)
    cap = max(_ROW_GRANULE, (cap // _ROW_GRANULE) * _ROW_GRANULE)
    cap = min(cap, _MAX_TILE_ROWS)
    if _NUM_TC >= 2:
        half = _round_up(max(-(-P // _NUM_TC), _ROW_GRANULE), _ROW_GRANULE)
        cap = min(cap, half)
    if P % _ROW_GRANULE == 0:
        t = (min(cap, P) // _ROW_GRANULE) * _ROW_GRANULE
        while t >= _ROW_GRANULE:
            if P % t == 0:
                return t
            t -= _ROW_GRANULE
    return min(cap, _round_up(P, _ROW_GRANULE))


def _pad_axis(x, size, axis):
    if x.shape[axis] == size:
        return x
    pad = [(0, 0)] * x.ndim
    pad[axis] = (0, size - x.shape[axis])
    return jnp.pad(x, pad)


# --------------------------------------------------------------------------
# Pallas kernels
# --------------------------------------------------------------------------
def _make_sa_kernel(n_layers, S, tile_p):
    """Fused multi-scale SA stage: one bf16 MXU dot chain over block-diagonal
    per-scale weights (f32 accumulation), intermediate bias+ReLU epilogue in
    bf16 on v6e/v7x (f32 on v5e), final layer kept f32 through the max-pool.
    Sample-major layout -> the max-pool is S-1 elementwise maxima over
    contiguous, sublane-aligned (tile_p, Cout) slabs (pure VPU)."""
    def kernel(*refs):
        x_ref, o_ref = refs[0], refs[-1]
        wb = refs[1:-1]
        # (S, tile_p, Cin) -> (S*tile_p, Cin): contiguous flatten (tile_p % 16 == 0)
        h = x_ref[...].reshape(S * tile_p, -1)
        for li in range(n_layers):
            w = wb[2 * li][...]
            b = wb[2 * li + 1][...]
            acc = jnp.dot(h, w, preferred_element_type=jnp.float32)
            if li + 1 < n_layers:
                if _BF16_EPILOGUE:       # bf16 VALU epilogue (v6e / v7x)
                    h = jnp.maximum(acc.astype(jnp.bfloat16)
                                    + b.astype(jnp.bfloat16), 0.0)
                else:                    # v5e has no bf16 VALU: keep f32 epilogue
                    h = jnp.maximum(acc + b, 0.0).astype(jnp.bfloat16)
            else:
                h = jnp.maximum(acc + b, 0.0)   # final layer stays f32 up to the max
        # max over the sample axis: static sublane-aligned row slices, VPU-only
        m = h[0:tile_p, :]
        for s in range(1, S):
            m = jnp.maximum(m, h[s * tile_p:(s + 1) * tile_p, :])
        o_ref[...] = m.astype(o_ref.dtype)       # single downcast at the store
    return kernel


def sa_msg_mlp_maxpool(x, weights, biases, num_points):
    """x: (S, P, Cin_tot) bf16 sample-major grouped features (all MSG scales
    lane-concatenated); weights: block-diagonal fused MLP layers.
    Returns (P, Cout_tot) bf16 (consumers re-cast to bf16; max/round commute)."""
    S, P, cin = x.shape
    assert P == num_points
    cout = weights[-1].shape[1]
    cmax = max(max(w.shape) for w in weights)
    # per-output-point working set: double-buffered bf16 input, f32 + bf16
    # intermediates, double-buffered bf16 output
    bytes_per_row = S * cin * 2 * 2 + S * cmax * 6 + cout * 2 * 2
    tile_p = _pick_tile_rows(P, bytes_per_row)
    P_pad = _round_up(P, tile_p)
    xp = _pad_axis(x, P_pad, axis=1)

    # TODO(synk): single-buffer the constant-index weight/bias operands
    # (pipeline_mode=pl.Buffered(1)) to drop their redundant double buffers.
    in_specs = [pl.BlockSpec((S, tile_p, cin), lambda i: (0, i, 0))]
    args = [xp]
    for w, b in zip(weights, biases):
        in_specs.append(pl.BlockSpec(w.shape, lambda i: (0, 0)))
        in_specs.append(pl.BlockSpec(b.shape, lambda i: (0, 0)))
        args.extend([w, b])

    out = pl.pallas_call(
        _make_sa_kernel(len(weights), S, tile_p),
        out_shape=jax.ShapeDtypeStruct((P_pad, cout), jnp.bfloat16),
        grid=(P_pad // tile_p,),
        in_specs=in_specs,
        out_specs=pl.BlockSpec((tile_p, cout), lambda i: (i, 0)),
        compiler_params=pltpu.CompilerParams(
            dimension_semantics=("parallel",),
            vmem_limit_bytes=_VMEM_LIMIT_BYTES),
    )(*args)
    return out if P_pad == P else out[:P]


def _make_fp_kernel(n_layers):
    def kernel(*refs):
        x_ref, o_ref = refs[0], refs[-1]
        wb = refs[1:-1]
        h = x_ref[...]                                # (tile_p, Cin) bf16
        for li in range(n_layers):
            w = wb[2 * li][...]
            b = wb[2 * li + 1][...]
            acc = jnp.dot(h, w, preferred_element_type=jnp.float32)
            if li + 1 < n_layers:
                if _BF16_EPILOGUE:
                    h = jnp.maximum(acc.astype(jnp.bfloat16)
                                    + b.astype(jnp.bfloat16), 0.0)
                else:
                    h = jnp.maximum(acc + b, 0.0).astype(jnp.bfloat16)
            else:
                h = jnp.maximum(acc + b, 0.0)
        o_ref[...] = h.astype(o_ref.dtype)
    return kernel


def fp_mlp(x, weights, biases, out_dtype=jnp.bfloat16):
    """x: (P, Cin) bf16 -> (P, Cout) point-wise MLP.  bf16 output for
    intermediate FP levels; f32 only for the final point_features."""
    P, cin = x.shape
    cout = weights[-1].shape[1]
    cmax = max(max(w.shape) for w in weights)
    out_b = jnp.dtype(out_dtype).itemsize
    bytes_per_row = cin * 2 * 2 + cmax * 6 + cout * out_b * 2
    tile_p = _pick_tile_rows(P, bytes_per_row)
    P_pad = _round_up(P, tile_p)
    xp = _pad_axis(x, P_pad, axis=0)

    in_specs = [pl.BlockSpec((tile_p, cin), lambda i: (i, 0))]
    args = [xp]
    for w, b in zip(weights, biases):
        in_specs.append(pl.BlockSpec(w.shape, lambda i: (0, 0)))
        in_specs.append(pl.BlockSpec(b.shape, lambda i: (0, 0)))
        args.extend([w, b])

    out = pl.pallas_call(
        _make_fp_kernel(len(weights)),
        out_shape=jax.ShapeDtypeStruct((P_pad, cout), out_dtype),
        grid=(P_pad // tile_p,),
        in_specs=in_specs,
        out_specs=pl.BlockSpec((tile_p, cout), lambda i: (i, 0)),
        compiler_params=pltpu.CompilerParams(
            dimension_semantics=("parallel",),
            vmem_limit_bytes=_VMEM_LIMIT_BYTES),
    )(*args)
    return out if P_pad == P else out[:P]


# --------------------------------------------------------------------------
# JAX glue (data-dependent sampling / grouping / gathers)
# --------------------------------------------------------------------------
# TODO(synk): FPS, ball-query and 3-NN gathers are data-dependent index ops;
# they stay in plain JAX rather than being forced into Pallas.
def farthest_point_sample(xyz, npoint):
    # xyz: (B, N, 3) -> (B, npoint) int32  (same iterative scheme as CUDA FPS)
    B, N, _ = xyz.shape

    def body(i, state):
        dists, idxs, farthest = state
        idxs = idxs.at[:, i].set(farthest)
        centroid = jnp.take_along_axis(xyz, farthest[:, None, None], axis=1)
        d = jnp.sum((xyz - centroid) ** 2, axis=-1)
        dists = jnp.minimum(dists, d)
        farthest = jnp.argmax(dists, axis=-1).astype(jnp.int32)
        return dists, idxs, farthest

    dists = jnp.full((B, N), 1e10, dtype=jnp.float32)
    idxs = jnp.zeros((B, npoint), dtype=jnp.int32)
    farthest = jnp.zeros((B,), dtype=jnp.int32)
    _, idxs, _ = jax.lax.fori_loop(0, npoint, body, (dists, idxs, farthest))
    return idxs


def ball_query(radius, nsample, xyz, new_xyz):
    # xyz: (B, N, 3), new_xyz: (B, np, 3) -> (B, np, nsample) int32
    # Partial selection via masked top_k instead of a full O(N log N) sort.
    N = xyz.shape[1]
    d2 = jnp.sum((new_xyz[:, :, None, :] - xyz[:, None, :, :]) ** 2, axis=-1)
    mask = d2 < radius ** 2
    order = jnp.where(mask, jnp.arange(N, dtype=jnp.int32)[None, None, :], N)
    neg_vals, _ = jax.lax.top_k(-order, nsample)   # nsample smallest, ascending
    idx = -neg_vals
    first = idx[..., :1]
    idx = jnp.where(idx == N, first, idx)   # duplicate first-found (CUDA semantics)
    idx = jnp.where(idx == N, 0, idx)       # no neighbor in radius -> index 0
    return idx.astype(jnp.int32)


def group_gather(data, idx):
    # data: (B, N, C), idx: (B, np, ns) -> (B, np, ns, C)
    B, np_, ns = idx.shape
    C = data.shape[-1]
    flat = idx.reshape(B, np_ * ns)
    g = jnp.take_along_axis(data, flat[:, :, None], axis=1)
    return g.reshape(B, np_, ns, C)


def three_interpolate(unknown, known, known_feats):
    # unknown: (B, n, 3), known: (B, m, 3), known_feats: (B, m, C) -> (B, n, C)
    d2 = jnp.sum((unknown[:, :, None, :] - known[:, None, :, :]) ** 2, axis=-1)
    neg_vals, idx = jax.lax.top_k(-d2, 3)                  # 3 nearest
    dist = jnp.sqrt(jnp.maximum(-neg_vals, 0.0))
    dist_recip = 1.0 / (dist + 1e-8)
    weight = dist_recip / jnp.sum(dist_recip, axis=-1, keepdims=True)
    B, n, _ = idx.shape
    C = known_feats.shape[-1]
    gathered = jnp.take_along_axis(
        known_feats, idx.reshape(B, n * 3)[:, :, None], axis=1).reshape(B, n, 3, C)
    return jnp.sum(gathered.astype(jnp.float32) * weight[..., None], axis=2)


# --------------------------------------------------------------------------
# Parameter construction (deterministic; BN identity-init folded into W/b)
# --------------------------------------------------------------------------
def make_mlp_params(key, dims):
    eps = 1e-5
    bn_scale = 1.0 / jnp.sqrt(jnp.float32(1.0 + eps))   # gamma=1, var=1, mean=0, beta=0
    weights, biases = [], []
    for i in range(len(dims) - 1):
        key, sub = jax.random.split(key)
        w = jax.random.normal(sub, (dims[i], dims[i + 1]), jnp.float32) * 0.1
        weights.append((w * bn_scale).astype(jnp.bfloat16))     # bf16 weights for MXU
        biases.append(jnp.zeros((1, dims[i + 1]), jnp.float32))  # f32 epilogue bias
    return key, weights, biases


def block_diag_concat(w_scales, b_scales):
    """Per-layer block-diagonal weight / lane-concatenated bias fusion of the
    MSG scales: scale channels stay independent, output channel order matches
    the PyTorch per-scale concat."""
    n_layers = len(w_scales[0])
    fw, fb = [], []
    for li in range(n_layers):
        mats = [w[li] for w in w_scales]
        rows = sum(m.shape[0] for m in mats)
        cols = sum(m.shape[1] for m in mats)
        wf = jnp.zeros((rows, cols), mats[0].dtype)
        r = c = 0
        for m in mats:
            wf = wf.at[r:r + m.shape[0], c:c + m.shape[1]].set(m)
            r += m.shape[0]
            c += m.shape[1]
        fw.append(wf)
        fb.append(jnp.concatenate([b[li] for b in b_scales], axis=-1))
    return fw, fb


class PointNet2MSGPallas:
    def __init__(self, model_cfg, input_channels, key):
        sa = model_cfg["SA_CONFIG"]
        self.sa_cfg = sa
        self.fp_mlps_cfg = model_cfg["FP_MLPS"]
        channel_in = input_channels - 3
        skip_channel_list = [channel_in]
        self.sa_params = []                     # per level: fused (weights, biases)
        channel_out = channel_in
        for k in range(len(sa["NPOINTS"])):
            w_scales, b_scales = [], []
            channel_out = 0
            for mlp in sa["MLPS"][k]:
                dims = [channel_in + 3] + list(mlp)   # use_xyz=True adds 3
                key, w, b = make_mlp_params(key, dims)
                w_scales.append(w)
                b_scales.append(b)
                channel_out += mlp[-1]
            depth = len(w_scales[0])
            assert all(len(w) == depth for w in w_scales), \
                "MSG scale fusion assumes equal per-scale MLP depth"
            self.sa_params.append(block_diag_concat(w_scales, b_scales))
            skip_channel_list.append(channel_out)
            channel_in = channel_out
        self.fp_params = []
        for k in range(len(self.fp_mlps_cfg)):
            pre_channel = (self.fp_mlps_cfg[k + 1][-1]
                           if k + 1 < len(self.fp_mlps_cfg) else channel_out)
            dims = [pre_channel + skip_channel_list[k]] + list(self.fp_mlps_cfg[k])
            key, w, b = make_mlp_params(key, dims)
            self.fp_params.append((w, b))
        self.num_point_features = self.fp_mlps_cfg[0][-1]

    def forward(self, batch_dict):
        batch_size = batch_dict["batch_size"]
        points = batch_dict["points"]
        batch_idx = points[:, 0]
        xyz = points[:, 1:4].reshape(batch_size, -1, 3)
        feats = None
        if points.shape[-1] > 4:
            feats = points[:, 4:].reshape(batch_size, -1, points.shape[-1] - 4)

        l_xyz, l_feats = [xyz], [feats]
        for level, (fw, fb) in enumerate(self.sa_params):
            cur_xyz, cur_feats = l_xyz[level], l_feats[level]
            npoint = self.sa_cfg["NPOINTS"][level]
            nsamples = self.sa_cfg["NSAMPLE"][level]
            radii = self.sa_cfg["RADIUS"][level]
            s_max = max(nsamples)
            B = batch_size

            fps_idx = farthest_point_sample(cur_xyz, npoint)
            new_xyz = jnp.take_along_axis(cur_xyz, fps_idx[:, :, None], axis=1)

            # TODO(synk): the neighborhood gather is still materialized by XLA;
            # moving it in-kernel (scalar-prefetched ball-query indices + gather
            # from a VMEM-resident feature table) would remove the xS-amplified
            # HBM round trip.
            g_scales = []
            for radius, ns in zip(radii, nsamples):
                idx = ball_query(radius, ns, cur_xyz, new_xyz)       # (B, np, ns)
                if ns < s_max:
                    # duplicate already-selected neighbors up to s_max: a no-op
                    # under max-pool, lets all scales share one fused dot chain
                    reps = -(-s_max // ns)
                    idx = jnp.tile(idx, (1, 1, reps))[..., :s_max]
                g_xyz = (group_gather(cur_xyz, idx)
                         - new_xyz[:, :, None, :]).astype(jnp.bfloat16)
                if cur_feats is not None:
                    g = jnp.concatenate(
                        [g_xyz, group_gather(cur_feats, idx).astype(jnp.bfloat16)],
                        axis=-1)
                else:
                    g = g_xyz
                g_scales.append(g)                    # (B, np, s_max, Cin_scale)
            fused_g = jnp.concatenate(g_scales, axis=-1)   # lane-concat the scales
            # sample-major layout: in-kernel max-pool = S-1 VPU maxima, no reshuffle
            fused_g = fused_g.reshape(B * npoint, s_max, -1).transpose(1, 0, 2)

            new_feats = sa_msg_mlp_maxpool(fused_g, fw, fb, B * npoint)  # bf16
            l_xyz.append(new_xyz)
            l_feats.append(new_feats.reshape(B, npoint, -1))

        # TODO(synk): three_interpolate's gather + weighted sum + skip concat could
        # be fused into fp_mlp via scalar-prefetched top-3 indices / weights.
        n_fp = len(self.fp_params)
        for i in range(-1, -(n_fp + 1), -1):
            unknown, known = l_xyz[i - 1], l_xyz[i]
            known_f, unknown_f = l_feats[i], l_feats[i - 1]
            interp = three_interpolate(unknown, known, known_f)     # (B, n, C) f32
            cat = (jnp.concatenate([interp, unknown_f.astype(interp.dtype)], axis=-1)
                   if unknown_f is not None else interp)
            B, n, cin = cat.shape
            w, b = self.fp_params[i]
            is_last = (i == -n_fp)     # final FP produces point_features (keep f32)
            out = fp_mlp(cat.reshape(B * n, cin).astype(jnp.bfloat16), w, b,
                         out_dtype=jnp.float32 if is_last else jnp.bfloat16)
            l_feats[i - 1] = out.reshape(B, n, -1)

        point_features = l_feats[0].reshape(-1, l_feats[0].shape[-1])
        point_coords = jnp.concatenate(
            [batch_idx[:, None], l_xyz[0].reshape(-1, 3)], axis=1)
        batch_dict["point_features"] = point_features
        batch_dict["point_coords"] = point_coords
        return batch_dict


# --------------------------------------------------------------------------
if __name__ == "__main__":
    MODEL_CFG = {
        "SA_CONFIG": {
            "NPOINTS": [32, 16],
            "RADIUS": [[0.5, 1.0], [1.0, 2.0]],
            "NSAMPLE": [[8, 16], [8, 16]],
            "MLPS": [[[16, 16, 32], [16, 16, 32]],
                     [[32, 32, 64], [32, 32, 64]]],
            "USE_XYZ": True,
        },
        "FP_MLPS": [[32, 32], [64, 64]],
    }
    INPUT_CHANNELS = 4   # (x, y, z, 1 extra feature); points = [bidx, x, y, z, f]

    key = jax.random.PRNGKey(0)
    key, kxyz, kfeat = jax.random.split(key, 3)

    batch_size, n_per_batch = 2, 64
    xyz = jax.random.uniform(kxyz, (batch_size * n_per_batch, 3),
                             jnp.float32, minval=0.0, maxval=4.0)
    feat = jax.random.normal(kfeat, (batch_size * n_per_batch, 1), jnp.float32)
    bidx = jnp.repeat(jnp.arange(batch_size, dtype=jnp.float32), n_per_batch)[:, None]
    points = jnp.concatenate([bidx, xyz, feat], axis=1)   # (128, 5)

    model = PointNet2MSGPallas(MODEL_CFG, INPUT_CHANNELS, key)

    # tolerance-asserted pure-JAX f32 reference for the FP Pallas kernel
    w_ref, b_ref = model.fp_params[-1]
    cin_ref = w_ref[0].shape[0]
    x_chk = jax.random.normal(jax.random.PRNGKey(1), (64, cin_ref),
                              jnp.float32).astype(jnp.bfloat16)
    got = fp_mlp(x_chk, w_ref, b_ref, out_dtype=jnp.float32)
    ref = x_chk.astype(jnp.float32)
    for w_l, b_l in zip(w_ref, b_ref):
        ref = jnp.maximum(ref @ w_l.astype(jnp.float32) + b_l, 0.0)
    assert jnp.allclose(got, ref, rtol=8e-2, atol=8e-2), "fp_mlp mismatch vs f32 ref"

    batch_dict = {"batch_size": batch_size, "points": points}
    out = model.forward(batch_dict)

    pf = jax.block_until_ready(out["point_features"])
    pc = jax.block_until_ready(out["point_coords"])
    assert pf.shape == (batch_size * n_per_batch, model.num_point_features)
    assert pf.dtype == jnp.float32
    assert pc.shape == (batch_size * n_per_batch, 4)
    assert bool(jnp.all(jnp.isfinite(pf)))
    print("KERNEL_OK")
</pallas_src>

<mosaic_0001>
module attributes {stable_mosaic.version = 11 : i64} {
  func.func @kernel(%arg0: i32, %arg1: memref<32x192xbf16, #tpu.memory_space<vmem>>, %arg2: memref<192x64xbf16, #tpu.memory_space<vmem>>, %arg3: memref<1x64xf32, #tpu.memory_space<vmem>>, %arg4: memref<64x64xbf16, #tpu.memory_space<vmem>>, %arg5: memref<1x64xf32, #tpu.memory_space<vmem>>, %arg6: memref<32x64xf32, #tpu.memory_space<vmem>>) attributes {dimension_semantics = [#tpu.dimension_semantics<parallel>], iteration_bounds = array<i64: 2>, scalar_prefetch = 0 : i64, scratch_operands = 0 : i64, tpu.core_type = #tpu.core_type<tc>, window_params = [{transform_indices = @transform_0, window_bounds = array<i64: 32, 192>}, {pipeline_mode = #tpu.pipeline_mode<synchronous>, transform_indices = @transform_1, window_bounds = array<i64: 192, 64>}, {pipeline_mode = #tpu.pipeline_mode<synchronous>, transform_indices = @transform_2, window_bounds = array<i64: 1, 64>}, {pipeline_mode = #tpu.pipeline_mode<synchronous>, transform_indices = @transform_3, window_bounds = array<i64: 64, 64>}, {pipeline_mode = #tpu.pipeline_mode<synchronous>, transform_indices = @transform_4, window_bounds = array<i64: 1, 64>}, {transform_indices = @transform_5, window_bounds = array<i64: 32, 64>}]} {
    %c0 = arith.constant 0 : index
    %c0_0 = arith.constant 0 : index
    %0 = vector.load %arg1[%c0, %c0_0] : memref<32x192xbf16, #tpu.memory_space<vmem>>, vector<32x192xbf16>
    %c0_1 = arith.constant 0 : index
    %c0_2 = arith.constant 0 : index
    %1 = vector.load %arg2[%c0_1, %c0_2] : memref<192x64xbf16, #tpu.memory_space<vmem>>, vector<192x64xbf16>
    %c0_3 = arith.constant 0 : index
    %c0_4 = arith.constant 0 : index
    %2 = vector.load %arg3[%c0_3, %c0_4] : memref<1x64xf32, #tpu.memory_space<vmem>>, vector<1x64xf32>
    %cst = arith.constant dense<0.000000e+00> : vector<32x64xf32>
    %3 = tpu.matmul %0, %1, %cst {dimension_numbers = #tpu.dot_dimension_numbers<[1], [0], [0], [1], [0, 0, 1, 1], [], []>} : vector<32x192xbf16>, vector<192x64xbf16>, vector<32x64xf32> -> vector<32x64xf32>
    %4 = vector.broadcast %2 : vector<1x64xf32> to vector<32x64xf32>
    %5 = arith.addf %3, %4 : vector<32x64xf32>
    %cst_5 = arith.constant 0.000000e+00 : f32
    %6 = vector.broadcast %cst_5 : f32 to vector<32x64xf32>
    %7 = arith.maximumf %5, %6 : vector<32x64xf32>
    %8 = arith.truncf %7 : vector<32x64xf32> to vector<32x64xbf16>
    %c0_6 = arith.constant 0 : index
    %c0_7 = arith.constant 0 : index
    %9 = vector.load %arg4[%c0_6, %c0_7] : memref<64x64xbf16, #tpu.memory_space<vmem>>, vector<64x64xbf16>
    %c0_8 = arith.constant 0 : index
    %c0_9 = arith.constant 0 : index
    %10 = vector.load %arg5[%c0_8, %c0_9] : memref<1x64xf32, #tpu.memory_space<vmem>>, vector<1x64xf32>
    %cst_10 = arith.constant dense<0.000000e+00> : vector<32x64xf32>
    %11 = tpu.matmul %8, %9, %cst_10 {dimension_numbers = #tpu.dot_dimension_numbers<[1], [0], [0], [1], [0, 0, 1, 1], [], []>} : vector<32x64xbf16>, vector<64x64xbf16>, vector<32x64xf32> -> vector<32x64xf32>
    %12 = vector.broadcast %10 : vector<1x64xf32> to vector<32x64xf32>
    %13 = arith.addf %11, %12 : vector<32x64xf32>
    %cst_11 = arith.constant 0.000000e+00 : f32
    %14 = vector.broadcast %cst_11 : f32 to vector<32x64xf32>
    %15 = arith.maximumf %13, %14 : vector<32x64xf32>
    %c0_12 = arith.constant 0 : index
    %c0_13 = arith.constant 0 : index
    %16 = vector.load %arg6[%c0_12, %c0_13] : memref<32x64xf32, #tpu.memory_space<vmem>>, vector<32x64xf32>
    tpu.vector_store %arg6[%c0_12, %c0_13], %15 {strides = array<i32>} : memref<32x64xf32, #tpu.memory_space<vmem>>, vector<32x64xf32>,
    return
  }
  func.func @transform_0(%arg0: i32) -> (i32, i32) {
    %c0_i32 = arith.constant 0 : i32
    %c0_i32_0 = arith.constant 0 : i32
    return %arg0, %c0_i32 : i32, i32
  }
  func.func @transform_1(%arg0: i32) -> (i32, i32) {
    %c0_i32 = arith.constant 0 : i32
    %c0_i32_0 = arith.constant 0 : i32
    %c0_i32_1 = arith.constant 0 : i32
    return %c0_i32, %c0_i32_0 : i32, i32
  }
  func.func @transform_2(%arg0: i32) -> (i32, i32) {
    %c0_i32 = arith.constant 0 : i32
    %c0_i32_0 = arith.constant 0 : i32
    %c0_i32_1 = arith.constant 0 : i32
    return %c0_i32, %c0_i32_0 : i32, i32
  }
  func.func @transform_3(%arg0: i32) -> (i32, i32) {
    %c0_i32 = arith.constant 0 : i32
    %c0_i32_0 = arith.constant 0 : i32
    %c0_i32_1 = arith.constant 0 : i32
    return %c0_i32, %c0_i32_0 : i32, i32
  }
  func.func @transform_4(%arg0: i32) -> (i32, i32) {
    %c0_i32 = arith.constant 0 : i32
    %c0_i32_0 = arith.constant 0 : i32
    %c0_i32_1 = arith.constant 0 : i32
    return %c0_i32, %c0_i32_0 : i32, i32
  }
  func.func @transform_5(%arg0: i32) -> (i32, i32) {
    %c0_i32 = arith.constant 0 : i32
    %c0_i32_0 = arith.constant 0 : i32
    return %arg0, %c0_i32 : i32, i32
  }
}

</mosaic_0001>

<bundles_post_ra>
// kernel: tpu_custom_call.1
= control target key start
LH: loop header
LB: loop body
LE: loop exit
PB: predicated region body
PF: predicated region fallthrough
CT: control target
= control target key end

     0   :  { %10 = vsyncpa [#allocation3], 0  ;;  %s962_s0 = inlined_call_operand.vmem [shape: bf16[64,192], index: 0, kind: input, shape index: {}]   ;;  %s963_s1 = inlined_call_operand.vmem [shape: bf16[192,64], index: 1, kind: input, shape index: {}]   ;;  %s964_s2 = inlined_call_operand.vmem [shape: f32[1,64], index: 2, kind: input, shape index: {}]   ;;  %s965_s3 = inlined_call_operand.vmem [shape: bf16[64,64], index: 3, kind: input, shape index: {}]   ;;  %s966_s4 = inlined_call_operand.vmem [shape: f32[1,64], index: 4, kind: input, shape index: {}]   ;;  %s967_s5 = inlined_call_operand.hbm [shape: f32[64,64], index: 5, kind: output, shape index: {}]  }
   0x1   :  { %12 = vsyncpa [#allocation3 + $0x1], 0  ;;  %s816_s18 = smov 0   ;;  %s818_s19 = smov 0  }
   0x2   :  { %s820_s20 = smov 0   ;;  %s822_s21 = smov 0  }
   0x3 LB: > { %s837_s22 = sadd.s32 4294967295, %s782_s21   ;;  %s550_s23 = sadd.s32 4294967294, %s782_s21   ;;  %s782_s21 = sphi %s822_s21, %s973_s21   ;;  %s778_s20 = sphi %s820_s20, %s972_s20   ;;  %s774_s19 = sphi %s818_s19, %s971_s19   ;;  %s770_s18 = sphi %s816_s18, %s970_s18  }
   0x4   : > { %s841_s24 = sadd.s32 1, %s782_s21   ;;  %s135_s25 = sadd.s32 1, %s778_s20 }
   0x5   : > { %s132_s26 = ssub.s32 %s782_s21, %s841_s24  ;;  %p145_p0 = scmp.ne.s32.totalorder %s778_s20, %s774_s19 }
   0x6   : > { %p133_p1 = scmp.eq.s32.totalorder %s132_s26, 0  ;;  %p146_p2 = scmp.eq.s32.totalorder %s837_s22, 1 }
   0x7   : > { %p151_p3 = scmp.ne.s32.totalorder %s774_s19, %s770_s18  ;;  %p152_p4 = scmp.eq.s32.totalorder %s550_s23, 1 }
   0x8   : > { %s852_s27 = scalar_select %p133_p1, %s778_s20, %s135_s25  }
   0x9   : > { %p854_p5 = por %p146_p2, %p145_p0  ;;  %p858_p6 = por %p152_p4, %p151_p3 }
   0xa   : > { %p553_p7 = scmp.ge.s32.totalorder %s782_s21, 1  ;;  %p192_p8 = scmp.lt.s32.totalorder %s782_s21, 3 }
   0xc   : > { %p193_p9 = pnand %p553_p7, %p192_p8 }
   0xd   : > { %s555_s7 = sshll.u32 (!%p193_p9), %s837_s22, 2  ;;  %s218_s12 = sand.u32 (!%p193_p9), 1, %s774_s19  }
   0xe   : > { %196 = sbr.rel (%p193_p9) target bundleno = 357 (0x165), region = 40  ;;  %p222_p10 = scmp.lt.s32.totalorder (!%p193_p9), %s555_s7, 7 }
   0xf   : > { %s554_s15 = sshll.u32 (!%p193_p9), %s218_s12, 5  ;;  %s668_s17 = sshll.u32 (!%p193_p9), %s837_s22, 5 }
  0x10   : > { %s484_s26 = scalar_lea.hbm (!%p193_p9), %s967_s5, %s668_s17  ;;  %s473_s8 = scalar_lea.sflag (!%p193_p9), [#allocation3], %s218_s12 }
  0x11   : > { %s740_s11 = scalar_lea.hbm (!%p193_p9), %s967_s5, 64 }
  0x13   : > { %v659_v0 = vld [vmem:[%s963_s1 + $0x38] sm:$0xff]  ;;  %v658_v2 = vld [vmem:[%s963_s1 + $0x30] sm:$0xff]  ;;  %s975_s7 = smov (!%p222_p10, %s555_s7), 7  ;;  %v657_v4 = vld [vmem:[%s963_s1 + $0x28] sm:$0xff]  ;;  %vm352_vm0 = vcmask 523264  }
  0x14   : > { %v663_v1 = vld [vmem:[%s963_s1 + $0x58] sm:$0xff]  ;;  %359 = vmatpush.bf16.msra.mxu0 %v659_v0  ;;  %669 = vmatpush.bf16.msra.mxu3 %v659_v0  ;;  %v662_v3 = vld [vmem:[%s963_s1 + $0x50] sm:$0xff]  ;;  %s647_s16 = sshll.u32 %s975_s7, 3  ;;  %v661_v5 = vld [vmem:[%s963_s1 + $0x48] sm:$0xff] }
  0x15   : > { %382 = vmatpush.bf16.msra.mxu1 %v663_v1  ;;  %s226_s30 = scalar_lea.vmem %s962_s0, %s647_s16  ;;  %v656_v6 = vld [vmem:[%s963_s1 + $0x20] sm:$0xff]  ;;  %v655_v10 = vld [vmem:[%s963_s1 + $0x18] sm:$0xff]  ;;  %v654_v12 = vld [vmem:[%s963_s1 + $0x10] sm:$0xff]  ;;  %s220_s16 = scalar_lea.vmem [#allocation2], %s554_s15 }
  0x16   : > { %v660_v7 = vld [vmem:[%s963_s1 + $0x40] sm:$0xff]  ;;  %v562_v9 = vld [vmem:[%s226_s30 + $0x8] sm:$0xf0]  ;;  %v649_v16 = vld [vmem:[%s226_s30 + $0x4] sm:$0xf0]  ;;  %s485_s6 = sshll.u32 %s220_s16, 4  ;;  %s486_s6 = int_to_ptr.vmem [resolvable:$true] %s485_s6 }
  0x17   : > { %v648_v8 = vld [vmem:[%s226_s30 + $0x4] sm:$0xf]  ;;  %v653_v13 = vld [vmem:[%s963_s1 + $0x8] sm:$0xff]  ;;  %v560_v15 = vld [vmem:[%s226_s30] sm:$0xf] }
  0x18   : > { %360 = vmatpush.bf16.msra.mxu0 %v658_v2  ;;  %670 = vmatpush.bf16.msra.mxu3 %v658_v2  ;;  %v565_v11 = vor.u32 %v648_v8, %v562_v9  ;;  %v652_v14 = vld [vmem:[%s963_s1] sm:$0xff]  ;;  %v568_v17 = vld [vmem:[%s226_s30 + $0x10] sm:$0xf]  ;;  %v651_v18 = vld [vmem:[%s226_s30 + $0x14] sm:$0xf0]  ;;  %v561_v21 = vor.u32 %v649_v16, %v560_v15 }
  0x19   : > { %383 = vmatpush.bf16.msra.mxu1 %v662_v3  ;;  %v650_v19 = vld [vmem:[%s226_s30 + $0x14] sm:$0xf]  ;;  %v570_v20 = vld [vmem:[%s226_s30 + $0x18] sm:$0xf0]  ;;  %v569_v22 = vor.u32 %v651_v18, %v568_v17  ;;  %v665_v26 = vld [vmem:[%s965_s3 + $0x8] sm:$0xff]  ;;  %s487_s30 = sshll.u32 %s484_s26, 4  ;;  %s488_s30 = int_to_ptr.hbm [resolvable:$true] %s487_s30 }
  0x1a   : > { %v573_v23 = vor.u32 %v650_v19, %v570_v20  ;;  %v667_v24 = vld [vmem:[%s965_s3 + $0x18] sm:$0xff]  ;;  %v666_v25 = vld [vmem:[%s965_s3 + $0x10] sm:$0xff]  ;;  %v664_v27 = vld [vmem:[%s965_s3] sm:$0xff]  ;;  %s734_s9 = sshra.s32 %s488_s30, 4  ;;  %s735_s9 = int_to_ptr.hbm [resolvable:$true] %s734_s9 }
  0x1b   : > { %449 = vmatpush.bf16.msra.mxu2 %v667_v24  ;;  %v718_v31 = vld [vmem:[%s964_s2] ss:$0 sm:$0xff]  ;;  %s736_s22 = scalar_lea.hbm %s735_s9, 32  ;;  %p741_p0 = scmp.lt.s32.totalorder %s735_s9, %s967_s5 }
  0x1c   : > { %361 = vmatpush.bf16.msra.mxu0 %v657_v4  ;;  %671 = vmatpush.bf16.msra.mxu3 %v657_v4  ;;  %v719_v51 = vld [vmem:[%s966_s4] ss:$0 sm:$0xff]  ;;  %p737_p11 = scmp.ne.s32.totalorder %s735_s9, %s736_s22  ;;  %p742_p1 = scmp.lt.s32.totalorder %s740_s11, %s736_s22 }
  0x1d   : > { %384 = vmatpush.bf16.msra.mxu1 %v661_v5 }
  0x1e   : > { %p738_p12 = pnand %p737_p11, %p854_p5  ;;  %p743_p2 = por %p742_p1, %p741_p0 }
  0x1f   : > { %450 = vmatpush.bf16.msra.mxu2 %v666_v25 }
  0x20   : > { %362 = vmatpush.bf16.msra.mxu0 %v656_v6  ;;  %672 = vmatpush.bf16.msra.mxu3 %v656_v6  ;;  %p739_p13 = pneg %p738_p12 }
  0x21   : > { %385 = vmatpush.bf16.msra.mxu1 %v660_v7 }
  0x22   : > { %p744_p3 = pnand %p743_p2, %p739_p13 }
  0x23   : > { %451 = vmatpush.bf16.msra.mxu2 %v665_v26 }
  0x24   : > { %363 = vmatpush.bf16.msra.mxu0 %v655_v10  ;;  %673 = vmatpush.bf16.msra.mxu3 %v655_v10 }
  0x25   : > { %622 = vmatmul.msk.bf16.vlgmr.msra.gmra.mxu1 %vm352_vm0, %v565_v11 }
  0x27   : > { %452 = vmatpush.bf16.msra.mxu2 %v664_v27 }
  0x28   : > { %364 = vmatpush.bf16.msra.mxu0 %v654_v12  ;;  %674 = vmatpush.bf16.msra.mxu3 %v654_v12 }
  0x2c   : > { %365 = vmatpush.bf16.msra.mxu0 %v653_v13  ;;  %675 = vmatpush.bf16.msra.mxu3 %v653_v13 }
  0x30   : > { %366 = vmatpush.bf16.msra.mxu0 %v652_v14  ;;  %676 = vmatpush.bf16.msra.mxu3 %v652_v14 }
  0x33   : > { %367 = vmatmul.bf16.vlgmr.msra.gmra.mxu0 %v561_v21  ;;  %372 = vmatmul.bf16.vlgmr.msra.gmra.mxu3 %v569_v22 }
  0x35   : > { %623 = vmatmul.msk.bf16.gmra.mxu1 %vm352_vm0, %v573_v23 }
  0xa2   : > { %v387_v28 = vpop.f32.mrf.mxu1 }
  0xaa   : > { %v389_v30 = vpop.f32.mrf.mxu1 }
  0xb0   : > { %v368_v29 = vpop.f32.mrf.mxu0 }
  0xb1   : > { %v369_v32 = vadd.f32 %v718_v31, %v368_v29 }
  0xb2   : > { %v392_v37 = vpop.f32.mrf.mxu1 }
  0xb3   : > { %v388_v35 = vadd.f32 %v387_v28, %v369_v32 }
  0xb5   : > { %v397_v39 = vmax.f32 %v388_v35, 0.0 }
  0xb6   : > { %v373_v33 = vpop.f32.mrf.mxu3 }
  0xb7   : > { %v374_v43 = vadd.f32 %v718_v31, %v373_v33 }
  0xb8   : > { %v370_v34 = vpop.f32.mrf.mxu0 }
  0xb9   : > { %v371_v36 = vadd.f32 %v718_v31, %v370_v34  ;;  %v393_v46 = vadd.f32 %v392_v37, %v374_v43 }
  0xba   : > { %v394_v45 = vpop.f32.mrf.mxu1 }
  0xbb   : > { %v390_v38 = vadd.f32 %v389_v30, %v371_v36  ;;  %v399_v48 = vmax.f32 %v393_v46, 0.0 }
  0xbd   : > { %v398_v40 = vmax.f32 %v390_v38, 0.0 }
  0xbe   : > { %v375_v42 = vpop.f32.mrf.mxu3 }
  0xbf   : > { %v401_v41 = vpack.c.bf16 %v398_v40, %v397_v39  ;;  %v376_v44 = vadd.f32 %v718_v31, %v375_v42 }
  0xc1   : > { %640 = vmatmul.msk.bf16.vlgmr.msra.gmra.mxu2 %vm352_vm0, %v401_v41  ;;  %v395_v47 = vadd.f32 %v394_v45, %v376_v44 }
  0xc3   : > { %v400_v49 = vmax.f32 %v395_v47, 0.0 }
  0xc5   : > { %v402_v50 = vpack.c.bf16 %v400_v49, %v399_v48 }
  0xd1   : > { %641 = vmatmul.msk.bf16.gmra.mxu2 %vm352_vm0, %v402_v50 }
 0x144   : > { %v454_v52 = vpop.f32.mrf.mxu2 }
 0x145   : > { %v455_v53 = vadd.f32 %v719_v51, %v454_v52 }
 0x147   : > { %v464_v54 = vmax.f32 %v455_v53, 0.0 }
 0x149   : > { %468 = vst.msk [vmem:[%s220_s16] sm:$0xff] %vm352_vm0, %v464_v54 }
 0x14c   : > { %v456_v55 = vpop.f32.mrf.mxu2 }
 0x14d   : > { %v457_v56 = vadd.f32 %v719_v51, %v456_v55 }
 0x14f   : > { %v465_v57 = vmax.f32 %v457_v56, 0.0 }
 0x151   : > { %469 = vst.msk [vmem:[%s220_s16 + $0x8] sm:$0xff] %vm352_vm0, %v465_v57 }
 0x154   : > { %v459_v58 = vpop.f32.mrf.mxu2 }
 0x155   : > { %v460_v59 = vadd.f32 %v719_v51, %v459_v58 }
 0x157   : > { %v466_v60 = vmax.f32 %v460_v59, 0.0 }
 0x159   : > { %470 = vst.msk [vmem:[%s220_s16 + $0x10] sm:$0xff] %vm352_vm0, %v466_v60 }
 0x15c   : > { %v461_v61 = vpop.f32.mrf.mxu2 }
 0x15d   : > { %v462_v62 = vadd.f32 %v719_v51, %v461_v61 }
 0x15f   : > { %v467_v63 = vmax.f32 %v462_v62, 0.0 }
 0x161   : > { %471 = vst.msk [vmem:[%s220_s16 + $0x18] sm:$0xff] %vm352_vm0, %v467_v63 }
 0x162   : > { %747 = shalt.err (!%p744_p3)
}
 0x163   : > { %s784_s12 = smov 128   ;;  %s785_s15 = smov 8  }
 0x164   : > { %677 = dma.vmem_to_hbm [thread:$0]  (%p854_p5), %s486_s6, 512, %s488_s30, %s473_s8, %s784_s12, %s784_s12, %s785_s15  }
 0x165 PF: > { %p683_p4 = scmp.ge.s32.totalorder %s782_s21, 2  ;;  %s502_s16 = sand.u32 1, %s770_s18  }
 0x166   : > { %s503_s17 = scalar_lea.sflag [#allocation3], %s502_s16 }
 0x167   : > { %p680_p7 = pnand %p683_p4, %p858_p6 }
 0x169   : > { %p681_p8 = pneg %p680_p7 }
 0x16b   : > { %765 = dma.done.wait (%p681_p8), %s503_s17, 512  }
 0x16c   : > { %767 = vsyncadd (%p681_p8), %s503_s17, 4294966784  ;;  %p15_p9 = scmp.ge.s32.totalorder %s841_s24, 4   ;;  %s970_s18 = smov %s774_s19 }
 0x16d   : > { %s971_s19 = smov %s778_s20  ;;  %s972_s20 = smov %s852_s27 }
 0x16e   : > { %s973_s21 = smov %s841_s24  ;;  %17 = sbr.rel (!%p15_p9) target bundleno = 3 (0x3), region = 75 }
 0x173   :  { %509 = vsyncpa [#allocation3], 1 }
 0x174   :  { %511 = vsyncpa [#allocation3 + $0x1], 1 }

</bundles_post_ra>
